<compile_context>
chip_gen: v5e
topology: v5e:2x2
jax: 0.10.0
libtpu: 0.0.40
codegen_flags: <defaults>
</compile_context>

<pallas_src>
import functools
import math

import numpy as np
import jax
import jax.numpy as jnp
from jax import lax
from jax.experimental import pallas as pl
from jax.experimental.pallas import tpu as pltpu


VMEM_LIMIT = 48 * 1024 * 1024   # explicit scoped-VMEM budget (review: v5e/v7x)


def _round_up(x, m):
    return (x + m - 1) // m * m


def _pick_row_tiling(m, max_tile=256):
    """Row tile (multiple of 8) and padded extent; >=2 tiles when possible (v7x)."""
    if m < 16:
        t = _round_up(max(m, 1), 8)
        return t, t
    tiles = max(2, -(-m // max_tile))
    t = _round_up(-(-m // tiles), 8)
    return t, t * tiles


# ----------------------------------------------------------------------------- #
# Weight-stationary fused matmul: out = relu_opt(a @ b + bias [+ residual])
# ----------------------------------------------------------------------------- #
def _mm_kernel(a_ref, b_ref, bias_ref, *rest, relu, has_res):
    if has_res:
        res_ref, o_ref = rest
    else:
        (o_ref,) = rest
    y = jnp.dot(a_ref[...], b_ref[...], preferred_element_type=jnp.float32)
    y = y + bias_ref[...]
    if has_res:
        y = y + res_ref[...].astype(jnp.float32)
    if relu:
        y = jnp.maximum(y, 0.0)
    o_ref[...] = y.astype(o_ref.dtype)


def fused_matmul(a, b_padded, bias_padded, residual=None, *, relu=False,
                 out_dtype=jnp.bfloat16):
    """a:(M,K) x b:(K,Np) with Np pre-padded to a lane multiple (BN folded into b).

    Full-K, full/large-N weight-stationary tiling: the weight panel is DMA'd once
    per N tile and reused across all M tiles; no K grid axis / accumulator phases.
    """
    M, K = a.shape
    K2, Np = b_padded.shape
    assert K == K2 and Np % 128 == 0
    tm, Mp = _pick_row_tiling(M, 256)
    tn = 512 if Np % 512 == 0 else (256 if Np % 256 == 0 else 128)
    tn = min(tn, Np)

    a = a.astype(jnp.bfloat16)
    if Mp != M:
        a = jnp.pad(a, ((0, Mp - M), (0, 0)))

    inputs = [a, b_padded, bias_padded]
    in_specs = [
        pl.BlockSpec((tm, K), lambda j, i: (i, 0)),
        pl.BlockSpec((K, tn), lambda j, i: (0, j)),     # constant across i -> 1 DMA
        pl.BlockSpec((1, tn), lambda j, i: (0, j)),
    ]
    has_res = residual is not None
    if has_res:
        r = residual.astype(jnp.bfloat16)
        if r.shape != (Mp, Np):
            r = jnp.pad(r, ((0, Mp - r.shape[0]), (0, Np - r.shape[1])))
        inputs.append(r)
        in_specs.append(pl.BlockSpec((tm, tn), lambda j, i: (i, j)))

    out = pl.pallas_call(
        functools.partial(_mm_kernel, relu=relu, has_res=has_res),
        out_shape=jax.ShapeDtypeStruct((Mp, Np), out_dtype),
        grid_spec=pltpu.PrefetchScalarGridSpec(
            num_scalar_prefetch=0,
            grid=(Np // tn, Mp // tm),
            in_specs=in_specs,
            out_specs=pl.BlockSpec((tm, tn), lambda j, i: (i, j)),
        ),
        compiler_params=pltpu.CompilerParams(
            dimension_semantics=("parallel", "parallel"),
            vmem_limit_bytes=VMEM_LIMIT),
    )(*inputs)
    return out[:M] if Mp != M else out


# ----------------------------------------------------------------------------- #
# Direct 3x3 conv: tap-accumulation kernel, no im2col in HBM
# ----------------------------------------------------------------------------- #
def _dconv_kernel(w_ref, bias_ref, x_ref, o_ref, acc_ref, *, d, wp, tq, relu):
    r = pl.program_id(1)
    t = pl.program_id(2)

    @pl.when(t == 0)
    def _():
        acc_ref[...] = jnp.zeros_like(acc_ref)

    ki = t // 3
    kj = t - 3 * ki
    start = r * tq + ki * (d * wp) + kj * d
    a = x_ref[0, pl.ds(start, tq), :]                 # (tq, C) window of flat input
    acc_ref[...] += jnp.dot(a, w_ref[0], preferred_element_type=jnp.float32)

    @pl.when(t == pl.num_programs(2) - 1)
    def _():
        y = acc_ref[...] + bias_ref[...]
        if relu:
            y = jnp.maximum(y, 0.0)
        o_ref[0] = y.astype(o_ref.dtype)


@functools.partial(jax.jit, static_argnames=("dilation", "stride", "relu", "n_out"))
def conv3x3_direct(x, w_taps, bias, *, dilation=1, stride=1, relu=True, n_out=None):
    """3x3 conv (padding == dilation), BN folded into (w_taps:(9,C,Np), bias:(1,Np)).

    The padded NHWC input is flattened once; each tap is a flat offset into the
    VMEM-resident input block, accumulated over the innermost (tap) grid axis.
    stride=2 is computed at stride 1 and subsampled (only two tiny layers use it).
    """
    B, H, W, C = x.shape
    _, C2, Np = w_taps.shape
    assert C2 == C
    d = dilation
    wp = W + 2 * d
    hp = H + 2 * d
    M = H * wp                                  # flat output rows (incl. junk cols)
    tq, Mq = _pick_row_tiling(M, 256)
    need = Mq + 2 * d * wp + 2 * d              # furthest flat read of any tap
    rows_extra = max(0, -(-(need - hp * wp) // wp))
    xp = jnp.pad(x.astype(jnp.bfloat16),
                 ((0, 0), (d, d + rows_extra), (d, d), (0, 0)))
    L = (hp + rows_extra) * wp
    xf = xp.reshape(B, L, C)

    out = pl.pallas_call(
        functools.partial(_dconv_kernel, d=d, wp=wp, tq=tq, relu=relu),
        out_shape=jax.ShapeDtypeStruct((B, Mq, Np), jnp.bfloat16),
        grid_spec=pltpu.PrefetchScalarGridSpec(
            num_scalar_prefetch=0,
            grid=(B, Mq // tq, 9),
            in_specs=[
                pl.BlockSpec((1, C, Np), lambda b, r, t: (t, 0, 0)),
                pl.BlockSpec((1, Np), lambda b, r, t: (0, 0)),
                pl.BlockSpec((1, L, C), lambda b, r, t: (b, 0, 0)),
            ],
            out_specs=pl.BlockSpec((1, tq, Np), lambda b, r, t: (b, r, 0)),
            scratch_shapes=[pltpu.VMEM((tq, Np), jnp.float32)],
        ),
        compiler_params=pltpu.CompilerParams(
            dimension_semantics=("parallel", "parallel", "arbitrary"),
            vmem_limit_bytes=VMEM_LIMIT),
    )(w_taps, bias, xf)

    out = out[:, :H * wp, :].reshape(B, H, wp, Np)[:, :, :W, :]
    if n_out is not None and n_out != Np:
        out = out[..., :n_out]
    if stride == 2:
        out = out[:, ::2, ::2, :]
    return out


# ----------------------------------------------------------------------------- #
# 1x1 conv wrapper (pure reshape + weight-stationary matmul)
# ----------------------------------------------------------------------------- #
@functools.partial(jax.jit, static_argnames=("stride", "relu", "n_out", "out_dtype"))
def conv1x1(x, w, bias, residual=None, *, stride=1, relu=True, n_out=None,
            out_dtype=jnp.bfloat16):
    B, H, W, C = x.shape
    if stride != 1:
        x = x[:, ::stride, ::stride, :]
        _, H, W, _ = x.shape
    Np = w.shape[1]
    a = x.reshape(B * H * W, C)
    res = None
    if residual is not None:
        res = residual.reshape(B * H * W, residual.shape[-1])
    y = fused_matmul(a, w, bias, res, relu=relu, out_dtype=out_dtype)
    y = y.reshape(B, H, W, Np)
    if n_out is not None and n_out != Np:
        y = y[..., :n_out]
    return y


# ----------------------------------------------------------------------------- #
# Stem 7x7 conv (im2col, K=147 and C_in=3 -- tiny) and maxpool
# ----------------------------------------------------------------------------- #
def _im2col(x, k, stride, padding):
    B, H, W, C = x.shape
    xp = jnp.pad(x, ((0, 0), (padding, padding), (padding, padding), (0, 0)))
    Ho = (H + 2 * padding - k) // stride + 1
    Wo = (W + 2 * padding - k) // stride + 1
    cols = []
    for i in range(k):
        for j in range(k):
            cols.append(xp[:, i:i + (Ho - 1) * stride + 1:stride,
                           j:j + (Wo - 1) * stride + 1:stride, :])
    return jnp.concatenate(cols, axis=-1), Ho, Wo


@functools.partial(jax.jit, static_argnames=("k", "stride", "padding", "n_out"))
def conv_stem(x, w, bias, *, k, stride, padding, n_out):
    # TODO(synk): direct-conv tap path only implemented for 3x3; the 7x7 stem keeps
    # a tiny im2col (C_in=3) feeding the fused matmul.
    patches, Ho, Wo = _im2col(x.astype(jnp.bfloat16), k, stride, padding)
    B = x.shape[0]
    a = patches.reshape(B * Ho * Wo, k * k * x.shape[-1])
    y = fused_matmul(a, w, bias, relu=True)
    return y.reshape(B, Ho, Wo, -1)[..., :n_out]


@jax.jit
def maxpool3x3_s2p1(x):
    neg = jnp.array(-jnp.inf, x.dtype)
    return lax.reduce_window(x, neg, lax.max, (1, 3, 3, 1), (1, 2, 2, 1),
                             padding=((0, 0), (1, 1), (1, 1), (0, 0)))


# ----------------------------------------------------------------------------- #
# Global average pool (f32 scratch accumulation)
# ----------------------------------------------------------------------------- #
def _gap_kernel(x_ref, o_ref, acc_ref, *, inv_hw):
    @pl.when(pl.program_id(1) == 0)
    def _():
        acc_ref[...] = jnp.zeros_like(acc_ref)

    acc_ref[...] += jnp.sum(x_ref[0].astype(jnp.float32), axis=0, keepdims=True)

    @pl.when(pl.program_id(1) == pl.num_programs(1) - 1)
    def _():
        o_ref[0] = (acc_ref[...] * inv_hw).astype(o_ref.dtype)


@jax.jit
def global_avg_pool(x):
    B, H, W, C = x.shape
    HW = H * W
    chunk = min(_round_up(HW, 8), 2048)
    HWp = _round_up(HW, chunk)
    x3 = x.reshape(B, HW, C)
    if HWp != HW:
        x3 = jnp.pad(x3, ((0, 0), (0, HWp - HW), (0, 0)))
    out = pl.pallas_call(
        functools.partial(_gap_kernel, inv_hw=1.0 / HW),
        out_shape=jax.ShapeDtypeStruct((B, 1, C), x.dtype),
        grid_spec=pltpu.PrefetchScalarGridSpec(
            num_scalar_prefetch=0,
            grid=(B, HWp // chunk),
            in_specs=[pl.BlockSpec((1, chunk, C), lambda b, k: (b, k, 0))],
            out_specs=pl.BlockSpec((1, 1, C), lambda b, k: (b, 0, 0)),
            scratch_shapes=[pltpu.VMEM((1, C), jnp.float32)],
        ),
        compiler_params=pltpu.CompilerParams(
            dimension_semantics=("parallel", "arbitrary"),
            vmem_limit_bytes=VMEM_LIMIT),
    )(x3)
    return out.reshape(B, 1, 1, C)


# ----------------------------------------------------------------------------- #
# Bilinear resize: one lane-dense f32 mixing-matrix matmul per batch row-block
# ----------------------------------------------------------------------------- #
def _resize_kernel(r_ref, x_ref, o_ref):
    o_ref[0] = jnp.dot(r_ref[...], x_ref[0].astype(jnp.float32),
                       preferred_element_type=jnp.float32).astype(o_ref.dtype)


def _interp_matrix(n_in, n_out, align_corners):
    o = np.arange(n_out, dtype=np.float64)
    if align_corners:
        src = np.zeros(n_out) if n_out == 1 else o * (n_in - 1) / max(n_out - 1, 1)
    else:
        src = np.clip((o + 0.5) * (n_in / n_out) - 0.5, 0.0, n_in - 1)
    i0 = np.clip(np.floor(src).astype(np.int64), 0, n_in - 1)
    i1 = np.minimum(i0 + 1, n_in - 1)
    w1 = src - i0
    R = np.zeros((n_out, n_in), dtype=np.float64)
    R[np.arange(n_out), i0] += 1.0 - w1
    R[np.arange(n_out), i1] += w1
    return R


@functools.partial(jax.jit,
                   static_argnames=("out_h", "out_w", "align_corners", "out_dtype"))
def bilinear_resize(x, *, out_h, out_w, align_corners, out_dtype=None):
    B, H, W, C = x.shape
    out_dtype = out_dtype or x.dtype
    if (H, W) == (out_h, out_w):
        return x.astype(out_dtype)
    if H == 1 and W == 1:
        return jnp.broadcast_to(x, (B, out_h, out_w, C)).astype(out_dtype)
    # Separable interp folded into one (out_h*out_w, H*W) f32 matrix: keeps C as the
    # lane dim, no HBM transposes, exact f32 interpolation weights.
    # TODO(synk): switch to a gather+lerp kernel for very large spatial sizes.
    R = np.kron(_interp_matrix(H, out_h, align_corners),
                _interp_matrix(W, out_w, align_corners)).astype(np.float32)
    Mo = out_h * out_w
    tm, Mop = _pick_row_tiling(Mo, 512)
    if Mop != Mo:
        R = np.pad(R, ((0, Mop - Mo), (0, 0)))
    Rj = jnp.asarray(R)
    xf = x.reshape(B, H * W, C)
    out = pl.pallas_call(
        _resize_kernel,
        out_shape=jax.ShapeDtypeStruct((B, Mop, C), out_dtype),
        grid_spec=pltpu.PrefetchScalarGridSpec(
            num_scalar_prefetch=0,
            grid=(B, Mop // tm),
            in_specs=[pl.BlockSpec((tm, H * W), lambda b, i: (i, 0)),
                      pl.BlockSpec((1, H * W, C), lambda b, i: (b, 0, 0))],
            out_specs=pl.BlockSpec((1, tm, C), lambda b, i: (b, i, 0)),
        ),
        compiler_params=pltpu.CompilerParams(
            dimension_semantics=("parallel", "parallel"),
            vmem_limit_bytes=VMEM_LIMIT),
    )(Rj, xf)
    return out[:, :Mo, :].reshape(B, out_h, out_w, C)


# ----------------------------------------------------------------------------- #
# Deterministic parameter construction (BN folded into weights, lane-padded)
# ----------------------------------------------------------------------------- #
class _KeyGen:
    def __init__(self, seed):
        self.key = jax.random.PRNGKey(seed)

    def __call__(self):
        self.key, k = jax.random.split(self.key)
        return k


KG = _KeyGen(1234)


def _conv_weight(cin, cout, k):
    std = math.sqrt(2.0 / (cin * k * k))
    return std * jax.random.normal(KG(), (k, k, cin, cout), jnp.float32)


def _bn_fold(c):
    gamma = 1.0 + 0.1 * jax.random.normal(KG(), (c,), jnp.float32)
    beta = 0.1 * jax.random.normal(KG(), (c,), jnp.float32)
    rmean = 0.1 * jax.random.normal(KG(), (c,), jnp.float32)
    rvar = 1.0 + 0.5 * jax.random.uniform(KG(), (c,), jnp.float32)
    scale = gamma / jnp.sqrt(rvar + 1e-5)
    bias = beta - rmean * scale
    return scale, bias


def _pack_conv(w, scale, bias):
    """Fold BN scale into w (f32), pad cout to a lane multiple, cast to bf16."""
    kh, kw, cin, cout = w.shape
    Np = _round_up(cout, 128)
    wf = w * scale.reshape(1, 1, 1, cout)
    wf = jnp.pad(wf, ((0, 0), (0, 0), (0, 0), (0, Np - cout)))
    b = jnp.pad(bias, (0, Np - cout)).reshape(1, Np).astype(jnp.float32)
    if kh == 1 and kw == 1:
        wp = wf.reshape(cin, Np).astype(jnp.bfloat16)              # 1x1: (K, Np)
    elif kh == 3 and kw == 3:
        wp = wf.reshape(9, cin, Np).astype(jnp.bfloat16)           # 3x3: per-tap
    else:
        wp = wf.reshape(kh * kw * cin, Np).astype(jnp.bfloat16)    # stem: im2col
    return {'w': wp, 'b': b, 'n': cout}


def build_resnet50_params(replace_stride_with_dilation):
    P = {'conv1': _pack_conv(_conv_weight(3, 64, 7), *_bn_fold(64))}
    inplanes, dilation, expansion = 64, 1, 4
    cfg = [(64, 3, 1, False),
           (128, 4, 2, replace_stride_with_dilation[0]),
           (256, 6, 2, replace_stride_with_dilation[1]),
           (512, 3, 2, replace_stride_with_dilation[2])]
    for li, (planes, nblocks, stride, dilate) in enumerate(cfg, start=1):
        prev_dil = dilation
        if dilate:
            dilation *= stride
            stride = 1
        blocks = []
        for bi in range(nblocks):
            s = stride if bi == 0 else 1
            dil = prev_dil if bi == 0 else dilation
            blk = {
                'conv1': _pack_conv(_conv_weight(inplanes, planes, 1),
                                    *_bn_fold(planes)),
                'conv2': _pack_conv(_conv_weight(planes, planes, 3),
                                    *_bn_fold(planes)),
                'conv3': _pack_conv(_conv_weight(planes, planes * expansion, 1),
                                    *_bn_fold(planes * expansion)),
                'stride': s, 'dilation': dil,
            }
            if bi == 0 and (s != 1 or inplanes != planes * expansion):
                blk['down'] = _pack_conv(
                    _conv_weight(inplanes, planes * expansion, 1),
                    *_bn_fold(planes * expansion))
            blocks.append(blk)
            inplanes = planes * expansion
        P[f'layer{li}'] = blocks
    return P


def build_aspp_params(cin, cout, rates):
    P = {'rates': list(rates),
         'b0': _pack_conv(_conv_weight(cin, cout, 1), *_bn_fold(cout)),
         'pool': _pack_conv(_conv_weight(cin, cout, 1), *_bn_fold(cout)),
         'proj': _pack_conv(_conv_weight(cout * (2 + len(rates)), cout, 1),
                            *_bn_fold(cout)),
         'branches': [_pack_conv(_conv_weight(cin, cout, 3), *_bn_fold(cout))
                      for _ in rates]}
    return P


def build_decoder_params(low_level_channels, num_classes):
    P = {'low': _pack_conv(_conv_weight(low_level_channels, 48, 1), *_bn_fold(48))}
    # c1 consumes concat([low projection kept lane-padded to 128 ch, 256-ch upsampled
    # features]) = 384 channels; scatter the true (304-in) weights into that layout.
    w = _conv_weight(48 + 256, 256, 3)
    w384 = jnp.zeros((3, 3, 384, 256), jnp.float32)
    w384 = w384.at[:, :, :48, :].set(w[:, :, :48, :])
    w384 = w384.at[:, :, 128:, :].set(w[:, :, 48:, :])
    P['c1'] = _pack_conv(w384, *_bn_fold(256))
    P['c2'] = _pack_conv(_conv_weight(256, 256, 3), *_bn_fold(256))
    wc = _conv_weight(256, num_classes, 1)
    bc = 0.1 * jax.random.normal(KG(), (num_classes,), jnp.float32)
    P['cls'] = _pack_conv(wc, jnp.ones((num_classes,), jnp.float32), bc)
    return P


def build_deeplab_params(num_classes=5, output_stride=16):
    if output_stride == 16:
        rswd, rates = [False, False, True], [6, 12, 18]
    elif output_stride == 8:
        rswd, rates = [False, True, True], [12, 24, 36]
    else:
        raise ValueError("output_stride must be 8 or 16")
    return {'resnet': build_resnet50_params(rswd),
            'aspp': build_aspp_params(2048, 256, rates),
            'decoder': build_decoder_params(256, num_classes),
            'num_classes': num_classes}


# ----------------------------------------------------------------------------- #
# Forward pass
# ----------------------------------------------------------------------------- #
def bottleneck_forward(x, p):
    out = conv1x1(x, p['conv1']['w'], p['conv1']['b'], n_out=p['conv1']['n'])
    out = conv3x3_direct(out, p['conv2']['w'], p['conv2']['b'],
                         dilation=p['dilation'], stride=p['stride'],
                         n_out=p['conv2']['n'])
    if 'down' in p:
        identity = conv1x1(x, p['down']['w'], p['down']['b'],
                           stride=p['stride'], relu=False, n_out=p['down']['n'])
    else:
        identity = x
    # conv3 + BN3 + residual-add + ReLU fused into one matmul epilogue.
    return conv1x1(out, p['conv3']['w'], p['conv3']['b'], identity,
                   relu=True, n_out=p['conv3']['n'])


def resnet_forward(x, P):
    c1 = P['conv1']
    x = conv_stem(x, c1['w'], c1['b'], k=7, stride=2, padding=3, n_out=c1['n'])
    x = maxpool3x3_s2p1(x)
    for blk in P['layer1']:
        x = bottleneck_forward(x, blk)
    low = x
    for li in (2, 3, 4):
        for blk in P[f'layer{li}']:
            x = bottleneck_forward(x, blk)
    return low, x


def aspp_forward(x, P):
    B, H, W, _ = x.shape
    outs = [conv1x1(x, P['b0']['w'], P['b0']['b'], n_out=P['b0']['n'])]
    for p, r in zip(P['branches'], P['rates']):
        outs.append(conv3x3_direct(x, p['w'], p['b'], dilation=r, n_out=p['n']))
    pooled = global_avg_pool(x)
    pooled = conv1x1(pooled, P['pool']['w'], P['pool']['b'], n_out=P['pool']['n'])
    pooled = jnp.broadcast_to(pooled, (B, H, W, pooled.shape[-1]))
    outs.append(pooled)
    cat = jnp.concatenate(outs, axis=-1)
    # Dropout(0.5) is identity in eval mode.
    return conv1x1(cat, P['proj']['w'], P['proj']['b'], n_out=P['proj']['n'])


def decoder_forward(low, high, P):
    # low-level projection is kept lane-padded (48 real + 80 zero channels); the c1
    # weights were built for this 384-channel concat layout.
    low_p = conv1x1(low, P['low']['w'], P['low']['b'])
    high_up = bilinear_resize(high, out_h=low.shape[1], out_w=low.shape[2],
                              align_corners=True)
    x = jnp.concatenate([low_p, high_up], axis=-1)
    x = conv3x3_direct(x, P['c1']['w'], P['c1']['b'], dilation=1, n_out=P['c1']['n'])
    x = conv3x3_direct(x, P['c2']['w'], P['c2']['b'], dilation=1, n_out=P['c2']['n'])
    # Classifier logits stay 128-lane padded (extra channels are exactly zero) so the
    # final upsample / transpose run lane-dense; sliced to num_classes at the end.
    logits = conv1x1(x, P['cls']['w'], P['cls']['b'], relu=False,
                     out_dtype=jnp.float32)
    return logits


def deeplabv3plus_forward(image_nchw, params):
    size = image_nchw.shape[-2:]
    x = jnp.transpose(image_nchw, (0, 2, 3, 1))            # NCHW -> NHWC
    low, high = resnet_forward(x, params['resnet'])
    high = aspp_forward(high, params['aspp'])
    y = decoder_forward(low, high, params['decoder'])
    y = bilinear_resize(y, out_h=size[0], out_w=size[1], align_corners=True,
                        out_dtype=jnp.float32)
    y = jnp.transpose(y, (0, 3, 1, 2))                      # NHWC -> NCHW
    return y[:, :params['num_classes']]


# ----------------------------------------------------------------------------- #
if __name__ == "__main__":
    # batch=2, RGB, 64x64 (output_stride=16 => high-level features are 4x4).
    key = jax.random.PRNGKey(0)
    image = jax.random.normal(key, (2, 3, 64, 64), jnp.float32)

    params = build_deeplab_params(num_classes=5, output_stride=16)

    out = deeplabv3plus_forward(image, params)
    out = jax.block_until_ready(out)

    assert out.shape == (2, 5, 64, 64), out.shape
    assert bool(jnp.all(jnp.isfinite(out)))
    print("KERNEL_OK")
</pallas_src>

<mosaic_0001>
module attributes {stable_mosaic.version = 11 : i64} {
  func.func @_mm_kernel(%arg0: i32, %arg1: i32, %arg2: memref<256x147xbf16, #tpu.memory_space<vmem>>, %arg3: memref<147x128xbf16, #tpu.memory_space<vmem>>, %arg4: memref<1x128xf32, #tpu.memory_space<vmem>>, %arg5: memref<256x128xbf16, #tpu.memory_space<vmem>>) attributes {dimension_semantics = [#tpu.dimension_semantics<parallel>, #tpu.dimension_semantics<parallel>], iteration_bounds = array<i64: 1, 8>, scalar_prefetch = 0 : i64, scratch_operands = 0 : i64, tpu.core_type = #tpu.core_type<tc>, window_params = [{transform_indices = @transform_0, window_bounds = array<i64: 256, 147>}, {transform_indices = @transform_1, window_bounds = array<i64: 147, 128>}, {transform_indices = @transform_2, window_bounds = array<i64: 1, 128>}, {transform_indices = @transform_3, window_bounds = array<i64: 256, 128>}]} {
    %c0 = arith.constant 0 : index
    %c0_0 = arith.constant 0 : index
    %0 = vector.load %arg2[%c0, %c0_0] : memref<256x147xbf16, #tpu.memory_space<vmem>>, vector<256x147xbf16>
    %c0_1 = arith.constant 0 : index
    %c0_2 = arith.constant 0 : index
    %1 = vector.load %arg3[%c0_1, %c0_2] : memref<147x128xbf16, #tpu.memory_space<vmem>>, vector<147x128xbf16>
    %cst = arith.constant dense<0.000000e+00> : vector<256x128xf32>
    %2 = tpu.matmul %0, %1, %cst {dimension_numbers = #tpu.dot_dimension_numbers<[1], [0], [0], [1], [0, 0, 1, 1], [], []>} : vector<256x147xbf16>, vector<147x128xbf16>, vector<256x128xf32> -> vector<256x128xf32>
    %c0_3 = arith.constant 0 : index
    %c0_4 = arith.constant 0 : index
    %3 = vector.load %arg4[%c0_3, %c0_4] : memref<1x128xf32, #tpu.memory_space<vmem>>, vector<1x128xf32>
    %4 = vector.broadcast %3 : vector<1x128xf32> to vector<256x128xf32>
    %5 = arith.addf %2, %4 : vector<256x128xf32>
    %cst_5 = arith.constant 0.000000e+00 : f32
    %6 = vector.broadcast %cst_5 : f32 to vector<256x128xf32>
    %7 = arith.maximumf %5, %6 : vector<256x128xf32>
    %8 = arith.truncf %7 : vector<256x128xf32> to vector<256x128xbf16>
    %c0_6 = arith.constant 0 : index
    %c0_7 = arith.constant 0 : index
    %9 = vector.load %arg5[%c0_6, %c0_7] : memref<256x128xbf16, #tpu.memory_space<vmem>>, vector<256x128xbf16>
    tpu.vector_store %arg5[%c0_6, %c0_7], %8 {strides = array<i32>} : memref<256x128xbf16, #tpu.memory_space<vmem>>, vector<256x128xbf16>,
    return
  }
  func.func @transform_0(%arg0: i32, %arg1: i32) -> (i32, i32) {
    %c0_i32 = arith.constant 0 : i32
    %c0_i32_0 = arith.constant 0 : i32
    return %arg1, %c0_i32 : i32, i32
  }
  func.func @transform_1(%arg0: i32, %arg1: i32) -> (i32, i32) {
    %c0_i32 = arith.constant 0 : i32
    %c0_i32_0 = arith.constant 0 : i32
    return %c0_i32, %arg0 : i32, i32
  }
  func.func @transform_2(%arg0: i32, %arg1: i32) -> (i32, i32) {
    %c0_i32 = arith.constant 0 : i32
    %c0_i32_0 = arith.constant 0 : i32
    return %c0_i32, %arg0 : i32, i32
  }
  func.func @transform_3(%arg0: i32, %arg1: i32) -> (i32, i32) {
    %c0_i32 = arith.constant 0 : i32
    return %arg1, %arg0 : i32, i32
  }
}

</mosaic_0001>

<bundles_post_ra>
// kernel: conv_stem.1
= control target key start
LH: loop header
LB: loop body
LE: loop exit
PB: predicated region body
PF: predicated region fallthrough
CT: control target
= control target key end

     0   :  { %8 = vsyncpa [#allocation3], 0  ;;  %s1703_s0 = inlined_call_operand.vmem [shape: bf16[2048,147], index: 0, kind: input, shape index: {}]   ;;  %s1704_s1 = inlined_call_operand.vmem [shape: bf16[147,128], index: 1, kind: input, shape index: {}]   ;;  %s1705_s2 = inlined_call_operand.vmem [shape: f32[1,128], index: 2, kind: input, shape index: {}]   ;;  %s1706_s3 = inlined_call_operand.hbm [shape: bf16[2048,128], index: 3, kind: output, shape index: {}]  }
   0x1   :  { %10 = vsyncpa [#allocation3 + $0x1], 0  ;;  %s1429_s12 = smov 0   ;;  %s1431_s13 = smov 0  }
   0x2   :  { %s1433_s14 = smov 0   ;;  %s1435_s15 = smov 0  }
   0x3   :  { %s1437_s16 = smov 0   ;;  %s1439_s17 = smov 0  }
   0x4 LB: > { %s923_s18 = sadd.s32 4294967295, %s1404_s17   ;;  %s924_s19 = sadd.s32 4294967294, %s1404_s17   ;;  %s1404_s17 = sphi %s1439_s17, %s16_s17   ;;  %s1400_s16 = sphi %s1437_s16, %s1713_s16   ;;  %s1396_s15 = sphi %s1435_s15, %s1712_s15   ;;  %s1392_s14 = sphi %s1433_s14, %s1711_s14   ;;  %s1388_s13 = sphi %s1431_s13, %s1710_s13   ;;  %s1384_s12 = sphi %s1429_s12, %s1709_s12  }
   0x5   : > { %s25_s20 = sadd.s32 1, %s1400_s16  ;;  %s115_s21 = sadd.s32 1, %s1392_s14 }
   0x6   : > { %p26_p0 = scmp.ge.s32.totalorder %s25_s20, 8  ;;  %p125_p1 = scmp.ne.s32.totalorder %s1392_s14, %s1388_s13 }
   0x7   : > { %p126_p2 = scmp.eq.s32.totalorder %s923_s18, 7  ;;  %p131_p3 = scmp.ne.s32.totalorder %s1388_s13, %s1384_s12 }
   0x8   : > { %s1715_s20 = smov (%p26_p0, %s25_s20), 0  ;;  %p132_p5 = scmp.eq.s32.totalorder %s924_s19, 7 }
   0x9   : > { %p1469_p4 = por %p126_p2, %p125_p1  ;;  %s110_s23 = ssub.s32 %s1400_s16, %s1715_s20 }
   0xa   : > { %p929_p6 = scmp.ge.s32.totalorder %s1404_s17, 1  ;;  %p113_p7 = scmp.eq.s32.totalorder %s110_s23, 0 }
   0xb   : > { %p1476_p8 = por %p132_p5, %p131_p3  ;;  %p173_p9 = scmp.lt.s32.totalorder %s1404_s17, 9 }
   0xc   : > { %s1482_s25 = scalar_select %p113_p7, %s1392_s14, %s115_s21  }
   0xd   : > { %p174_p10 = pnand %p929_p6, %p173_p9 }
   0xe   : > { %s931_s30 = sshll.u32 (!%p174_p10), %s1396_s15, 5  ;;  %s202_s9 = sand.u32 (!%p174_p10), 1, %s1388_s13  }
   0xf   : > { %177 = sbr.rel (%p174_p10) target bundleno = 316 (0x13c), region = 32  ;;  %p206_p11 = scmp.lt.s32.totalorder (!%p174_p10), %s931_s30, 255 }
  0x10   : > { %s930_s10 = sshll.u32 (!%p174_p10), %s202_s9, 7  ;;  %s1161_s18 = sshll.u32 (!%p174_p10), %s1396_s15, 7 }
  0x11   : > { %s1614_s11 = scalar_lea.vmem (!%p174_p10), [#allocation2], %s930_s10  ;;  %s820_s23 = scalar_lea.hbm (!%p174_p10), %s1706_s3, %s1161_s18 }
  0x12   : > { %s821_s26 = sshll.u32 (!%p174_p10), %s1614_s11, 4  ;;  %s823_s27 = sshll.u32 (!%p174_p10), %s820_s23, 4  ;;  %s822_s26 = int_to_ptr.vmem [resolvable:$true] %s821_s26  ;;  %s824_s27 = int_to_ptr.hbm [resolvable:$true] %s823_s27 }
  0x13   : > { %s808_s15 = scalar_lea.sflag (!%p174_p10), [#allocation3], %s202_s9  ;;  %s1340_s28 = sshra.s32 (!%p174_p10), %s824_s27, 4  ;;  %s1341_s28 = int_to_ptr.hbm [resolvable:$true] %s1340_s28 }
  0x14   : > { %v1159_v0 = vld [vmem:[%s1704_s1 + $0x38] sm:$0xff]  ;;  %v271_v1 = vld [vmem:[%s1704_s1 + $0x48] sm:$0x3]  ;;  %vm526_vm0 = vcmask 1040384   ;;  %vm527_vm1 = vcmask 1041408   ;;  %v1158_v3 = vld [vmem:[%s1704_s1 + $0x30] sm:$0xff]  ;;  %p1347_p1 = scmp.lt.s32.totalorder %s1341_s28, %s1706_s3 }
  0x15   : > { %v457_v2 = vunpack.c.l.b16 %v271_v1  ;;  %533 = vmatpush.bf16.msra.mxu0 %v1159_v0  ;;  %1257 = vmatpush.bf16.msra.mxu2 %v1159_v0  ;;  %v1406_v4 = vmov 65535   ;;  %s1717_s30 = smov (!%p206_p11, %s931_s30), 255  ;;  %v1157_v9 = vld [vmem:[%s1704_s1 + $0x28] sm:$0xff]  ;;  %v1160_v10 = vld [vmem:[%s1704_s1 + $0x40] sm:$0xff]  ;;  %vm477_vm2 = vcmask 154624   ;;  %v1155_v18 = vld [vmem:[%s1704_s1 + $0x18] sm:$0xff] }
  0x16   : > { %v528_v5 = vsel %vm526_vm0, 4294967295, %v1406_v4  ;;  %s1119_s8 = sshll.u32 %s1717_s30, 3  ;;  %v1156_v14 = vld [vmem:[%s1704_s1 + $0x20] sm:$0xff]  ;;  %v1154_v19 = vld [vmem:[%s1704_s1 + $0x10] sm:$0xff]  ;;  %v1153_v20 = vld [vmem:[%s1704_s1 + $0x8] sm:$0xff]  ;;  %s1342_s29 = scalar_lea.hbm %s1341_s28, 128 }
  0x17   : > { %v467_v6 = vpack.c.b16 %v457_v2, %v457_v2  ;;  %v529_v7 = vsel %vm527_vm1, %v528_v5, 0  ;;  %s1503_s19 = scalar_lea.vmem %s1703_s0, %s1119_s8  ;;  %v1152_v26 = vld [vmem:[%s1704_s1] sm:$0xff]  ;;  %p1343_p12 = scmp.ne.s32.totalorder %s1341_s28, %s1342_s29 }
  0x18   : > { %v1120_v11 = vld [vmem:[%s1503_s19 + $0x4] sm:$0xf]  ;;  %v938_v12 = vld [vmem:[%s1503_s19 + $0x8] sm:$0xf0]  ;;  %v1138_v15 = vld [vmem:[%s1503_s19 + $0x94] sm:$0xf] }
  0x19   : > { %v531_v8 = vand.u32 %v529_v7, %v467_v6  ;;  %534 = vmatpush.bf16.msra.mxu0 %v1158_v3  ;;  %1258 = vmatpush.bf16.msra.mxu2 %v1158_v3  ;;  %v941_v13 = vor.u32 %v1120_v11, %v938_v12  ;;  %v1010_v16 = vld [vmem:[%s1503_s19 + $0x98] sm:$0xf0]  ;;  %v1122_v21 = vld [vmem:[%s1503_s19 + $0x14] sm:$0xf]  ;;  %v1140_v23 = vld [vmem:[%s1503_s19 + $0xa4] sm:$0xf]  ;;  %p1344_p13 = pnand %p1343_p12, %p1469_p4 }
  0x1a   : > { %v1013_v17 = vor.u32 %v1138_v15, %v1010_v16  ;;  %v946_v22 = vld [vmem:[%s1503_s19 + $0x18] sm:$0xf0]  ;;  %v1018_v24 = vld [vmem:[%s1503_s19 + $0xa8] sm:$0xf0]  ;;  %v936_v27 = vld [vmem:[%s1503_s19] sm:$0xf] }
  0x1b   : > { %628 = vmatpush.bf16.msra.mxu1 %v531_v8  ;;  %1265 = vmatpush.bf16.msra.mxu3 %v531_v8  ;;  %v949_v25 = vor.u32 %v1122_v21, %v946_v22  ;;  %v1121_v28 = vld [vmem:[%s1503_s19 + $0x4] sm:$0xf0]  ;;  %v1000_v29 = vld [vmem:[%s1503_s19 + $0x80] sm:$0xf]  ;;  %v1021_v31 = vor.u32 %v1140_v23, %v1018_v24  ;;  %v1124_v34 = vld [vmem:[%s1503_s19 + $0x24] sm:$0xf]  ;;  %p1345_p0 = pneg %p1344_p13 }
  0x1c   : > { %v1137_v30 = vld [vmem:[%s1503_s19 + $0x84] sm:$0xf0]  ;;  %v937_v32 = vor.u32 %v1121_v28, %v936_v27  ;;  %v954_v35 = vld [vmem:[%s1503_s19 + $0x28] sm:$0xf0]  ;;  %v1142_v36 = vld [vmem:[%s1503_s19 + $0xb4] sm:$0xf] }
  0x1d   : > { %535 = vmatpush.bf16.msra.mxu0 %v1157_v9  ;;  %1259 = vmatpush.bf16.msra.mxu2 %v1157_v9  ;;  %v1001_v33 = vor.u32 %v1137_v30, %v1000_v29  ;;  %v1026_v37 = vld [vmem:[%s1503_s19 + $0xb8] sm:$0xf0]  ;;  %v957_v38 = vor.u32 %v1124_v34, %v954_v35  ;;  %v944_v39 = vld [vmem:[%s1503_s19 + $0x10] sm:$0xf]  ;;  %v1123_v40 = vld [vmem:[%s1503_s19 + $0x14] sm:$0xf0] }
  0x1e   : > { %v1008_v41 = vld [vmem:[%s1503_s19 + $0x90] sm:$0xf]  ;;  %v1139_v42 = vld [vmem:[%s1503_s19 + $0x94] sm:$0xf0]  ;;  %v1029_v43 = vor.u32 %v1142_v36, %v1026_v37  ;;  %v945_v44 = vor.u32 %v1123_v40, %v944_v39  ;;  %v1126_v46 = vld [vmem:[%s1503_s19 + $0x34] sm:$0xf] }
  0x1f   : > { %629 = vmatpush.bf16.msra.mxu1 %v1160_v10  ;;  %1266 = vmatpush.bf16.msra.mxu3 %v1160_v10  ;;  %v1009_v45 = vor.u32 %v1139_v42, %v1008_v41  ;;  %v962_v47 = vld [vmem:[%s1503_s19 + $0x38] sm:$0xf0]  ;;  %v1144_v48 = vld [vmem:[%s1503_s19 + $0xc4] sm:$0xf]  ;;  %v1034_v49 = vld [vmem:[%s1503_s19 + $0xc8] sm:$0xf0] }
  0x20   : > { %v965_v50 = vor.u32 %v1126_v46, %v962_v47  ;;  %v952_v51 = vld [vmem:[%s1503_s19 + $0x20] sm:$0xf]  ;;  %v1125_v52 = vld [vmem:[%s1503_s19 + $0x24] sm:$0xf0]  ;;  %v1037_v55 = vor.u32 %v1144_v48, %v1034_v49  ;;  %v1128_v58 = vld [vmem:[%s1503_s19 + $0x44] sm:$0xf] }
  0x21   : > { %536 = vmatpush.bf16.msra.mxu0 %v1156_v14  ;;  %1260 = vmatpush.bf16.msra.mxu2 %v1156_v14  ;;  %v1016_v53 = vld [vmem:[%s1503_s19 + $0xa0] sm:$0xf]  ;;  %v1141_v54 = vld [vmem:[%s1503_s19 + $0xa4] sm:$0xf0]  ;;  %v953_v56 = vor.u32 %v1125_v52, %v952_v51  ;;  %v970_v59 = vld [vmem:[%s1503_s19 + $0x48] sm:$0xf0] }
  0x22   : > { %1098 = vmatmul.msk.bf16.vlgmr.msra.gmra.mxu1 %vm477_vm2, %v941_v13  ;;  %1107 = vmatmul.msk.bf16.vlgmr.msra.gmra.mxu3 %vm477_vm2, %v1013_v17  ;;  %v1017_v57 = vor.u32 %v1141_v54, %v1016_v53  ;;  %v1146_v60 = vld [vmem:[%s1503_s19 + $0xd4] sm:$0xf]  ;;  %v1042_v61 = vld [vmem:[%s1503_s19 + $0xd8] sm:$0xf0]  ;;  %v973_v62 = vor.u32 %v1128_v58, %v970_v59  ;;  %v960_v63 = vld [vmem:[%s1503_s19 + $0x30] sm:$0xf] }
  0x23   : > { %v1127_v0 = vld [vmem:[%s1503_s19 + $0x34] sm:$0xf0]  ;;  %v1024_v1 = vld [vmem:[%s1503_s19 + $0xb0] sm:$0xf]  ;;  %v1045_v3 = vor.u32 %v1146_v60, %v1042_v61  ;;  %v1130_v6 = vld [vmem:[%s1503_s19 + $0x54] sm:$0xf] }
  0x24   : > { %v1143_v2 = vld [vmem:[%s1503_s19 + $0xb4] sm:$0xf0]  ;;  %v961_v4 = vor.u32 %v1127_v0, %v960_v63  ;;  %v978_v7 = vld [vmem:[%s1503_s19 + $0x58] sm:$0xf0]  ;;  %v1148_v8 = vld [vmem:[%s1503_s19 + $0xe4] sm:$0xf] }
  0x25   : > { %537 = vmatpush.bf16.msra.mxu0 %v1155_v18  ;;  %1261 = vmatpush.bf16.msra.mxu2 %v1155_v18  ;;  %v1025_v5 = vor.u32 %v1143_v2, %v1024_v1  ;;  %v1050_v9 = vld [vmem:[%s1503_s19 + $0xe8] sm:$0xf0]  ;;  %v981_v10 = vor.u32 %v1130_v6, %v978_v7  ;;  %v968_v11 = vld [vmem:[%s1503_s19 + $0x40] sm:$0xf]  ;;  %v1129_v12 = vld [vmem:[%s1503_s19 + $0x44] sm:$0xf0] }
  0x26   : > { %v1032_v13 = vld [vmem:[%s1503_s19 + $0xc0] sm:$0xf]  ;;  %v1145_v14 = vld [vmem:[%s1503_s19 + $0xc4] sm:$0xf0]  ;;  %v1053_v15 = vor.u32 %v1148_v8, %v1050_v9  ;;  %v969_v16 = vor.u32 %v1129_v12, %v968_v11  ;;  %v1132_v18 = vld [vmem:[%s1503_s19 + $0x64] sm:$0xf] }
  0x27   : > { %v1033_v17 = vor.u32 %v1145_v14, %v1032_v13  ;;  %v1058_v21 = vld [vmem:[%s1503_s19 + $0xf8] sm:$0xf0]  ;;  %v976_v23 = vld [vmem:[%s1503_s19 + $0x50] sm:$0xf]  ;;  %v1131_v24 = vld [vmem:[%s1503_s19 + $0x54] sm:$0xf0] }
  0x28   : > { %v977_v28 = vor.u32 %v1131_v24, %v976_v23  ;;  %v1134_v30 = vld [vmem:[%s1503_s19 + $0x74] sm:$0xf]  ;;  %v1133_v34 = vld [vmem:[%s1503_s19 + $0x64] sm:$0xf0]  ;;  %v1048_v35 = vld [vmem:[%s1503_s19 + $0xe0] sm:$0xf] }
  0x29   : > { %538 = vmatpush.bf16.msra.mxu0 %v1154_v19  ;;  %1262 = vmatpush.bf16.msra.mxu2 %v1154_v19  ;;  %v986_v19 = vld [vmem:[%s1503_s19 + $0x68] sm:$0xf0]  ;;  %v1149_v36 = vld [vmem:[%s1503_s19 + $0xe4] sm:$0xf0]  ;;  %v1136_v39 = vld [vmem:[%s1503_s19 + $0x84] sm:$0xf] }
  0x2a   : > { %v989_v22 = vor.u32 %v1132_v18, %v986_v19  ;;  %v1002_v40 = vld [vmem:[%s1503_s19 + $0x88] sm:$0xf0]  ;;  %v992_v42 = vld [vmem:[%s1503_s19 + $0x70] sm:$0xf]  ;;  %v1151_v46 = vld [vmem:[%s1503_s19 + $0xf4] sm:$0xf0] }
  0x2b   : > { %v1005_v41 = vor.u32 %v1136_v39, %v1002_v40  ;;  %v1603_v53 = vld [vmem:[%s1705_s2] ss:$0 sm:$0xff]  ;;  %s1346_s5 = scalar_lea.hbm %s1706_s3, 1024 }
  0x2c   : > { %p1348_p2 = scmp.lt.s32.totalorder %s1346_s5, %s1342_s29 }
  0x2d   : > { %539 = vmatpush.bf16.msra.mxu0 %v1153_v20  ;;  %1263 = vmatpush.bf16.msra.mxu2 %v1153_v20  ;;  %v1150_v20 = vld [vmem:[%s1503_s19 + $0xf4] sm:$0xf] }
  0x2e   : > { %v1061_v27 = vor.u32 %v1150_v20, %v1058_v21  ;;  %p1349_p3 = por %p1348_p2, %p1347_p1 }
  0x30   : > { %p1350_p5 = pnand %p1349_p3, %p1345_p0 }
  0x31   : > { %540 = vmatpush.bf16.msra.mxu0 %v1152_v26  ;;  %1264 = vmatpush.bf16.msra.mxu2 %v1152_v26  ;;  %v1147_v26 = vld [vmem:[%s1503_s19 + $0xd4] sm:$0xf0] }
  0x32   : > { %1099 = vmatmul.msk.bf16.gmra.mxu1 %vm477_vm2, %v949_v25  ;;  %1108 = vmatmul.msk.bf16.gmra.mxu3 %vm477_vm2, %v1021_v31  ;;  %v1040_v25 = vld [vmem:[%s1503_s19 + $0xd0] sm:$0xf]  ;;  %v994_v31 = vld [vmem:[%s1503_s19 + $0x78] sm:$0xf0] }
  0x33   : > { %v1041_v29 = vor.u32 %v1147_v26, %v1040_v25 }
  0x34   : > { %541 = vmatmul.bf16.vlgmr.msra.gmra.mxu0 %v937_v32  ;;  %581 = vmatmul.bf16.vlgmr.msra.gmra.mxu2 %v1001_v33  ;;  %v997_v32 = vor.u32 %v1134_v30, %v994_v31  ;;  %v984_v33 = vld [vmem:[%s1503_s19 + $0x60] sm:$0xf] }
  0x35   : > { %v985_v37 = vor.u32 %v1133_v34, %v984_v33 }
  0x42   : > { %1100 = vmatmul.msk.bf16.gmra.mxu1 %vm477_vm2, %v957_v38  ;;  %1109 = vmatmul.msk.bf16.gmra.mxu3 %vm477_vm2, %v1029_v43  ;;  %v1049_v38 = vor.u32 %v1149_v36, %v1048_v35  ;;  %v1135_v43 = vld [vmem:[%s1503_s19 + $0x74] sm:$0xf0] }
  0x43   : > { %v993_v47 = vor.u32 %v1135_v43, %v992_v42 }
  0x44   : > { %546 = vmatmul.bf16.gmra.mxu0 %v945_v44  ;;  %586 = vmatmul.bf16.gmra.mxu2 %v1009_v45  ;;  %v1056_v45 = vld [vmem:[%s1503_s19 + $0xf0] sm:$0xf] }
  0x45   : > { %v1057_v48 = vor.u32 %v1151_v46, %v1056_v45 }
  0x52   : > { %1101 = vmatmul.msk.bf16.gmra.mxu1 %vm477_vm2, %v965_v50  ;;  %1110 = vmatmul.msk.bf16.gmra.mxu3 %vm477_vm2, %v1037_v55 }
  0x54   : > { %551 = vmatmul.bf16.gmra.mxu0 %v953_v56  ;;  %591 = vmatmul.bf16.gmra.mxu2 %v1017_v57 }
  0x62   : > { %1102 = vmatmul.msk.bf16.gmra.mxu1 %vm477_vm2, %v973_v62  ;;  %1111 = vmatmul.msk.bf16.gmra.mxu3 %vm477_vm2, %v1045_v3 }
  0x64   : > { %556 = vmatmul.bf16.gmra.mxu0 %v961_v4  ;;  %596 = vmatmul.bf16.gmra.mxu2 %v1025_v5 }
  0x72   : > { %1103 = vmatmul.msk.bf16.gmra.mxu1 %vm477_vm2, %v981_v10  ;;  %1112 = vmatmul.msk.bf16.gmra.mxu3 %vm477_vm2, %v1053_v15 }
  0x74   : > { %561 = vmatmul.bf16.gmra.mxu0 %v969_v16  ;;  %601 = vmatmul.bf16.gmra.mxu2 %v1033_v17 }
  0x82   : > { %1104 = vmatmul.msk.bf16.gmra.mxu1 %vm477_vm2, %v989_v22  ;;  %1113 = vmatmul.msk.bf16.gmra.mxu3 %vm477_vm2, %v1061_v27 }
  0x84   : > { %566 = vmatmul.bf16.gmra.mxu0 %v977_v28  ;;  %606 = vmatmul.bf16.gmra.mxu2 %v1041_v29 }
  0x92   : > { %1105 = vmatmul.msk.bf16.gmra.mxu1 %vm477_vm2, %v997_v32 }
  0x94   : > { %571 = vmatmul.bf16.gmra.mxu0 %v985_v37  ;;  %611 = vmatmul.bf16.gmra.mxu2 %v1049_v38 }
  0x9f   : > { %v631_v44 = vpop.f32.mrf.mxu1 }
  0xa2   : > { %1106 = vmatmul.msk.bf16.gmra.mxu1 %vm477_vm2, %v1005_v41 }
  0xa4   : > { %576 = vmatmul.bf16.gmra.mxu0 %v993_v47  ;;  %616 = vmatmul.bf16.gmra.mxu2 %v1057_v48 }
  0xa5   : > { %v676_v51 = vpop.f32.mrf.mxu3 }
  0xa7   : > { %v633_v49 = vpop.f32.mrf.mxu1 }
  0xad   : > { %v678_v60 = vpop.f32.mrf.mxu3 }
  0xaf   : > { %v636_v50 = vpop.f32.mrf.mxu1 }
  0xb1   : > { %v542_v52 = vpop.f32.mrf.mxu0 }
  0xb2   : > { %v543_v54 = vadd.f32 %v1603_v53, %v542_v52 }
  0xb4   : > { %v632_v58 = vadd.f32 %v631_v44, %v543_v54 }
  0xb5   : > { %v681_v4 = vpop.f32.mrf.mxu3 }
  0xb6   : > { %v711_v62 = vmax.f32 %v632_v58, 0.0 }
  0xb7   : > { %v638_v55 = vpop.f32.mrf.mxu1  ;;  %v1606_v56 = vpop.f32.mrf.mxu2 }
  0xb9   : > { %v544_v57 = vpop.f32.mrf.mxu0 }
  0xba   : > { %v545_v59 = vadd.f32 %v1603_v53, %v544_v57 }
  0xbc   : > { %v634_v61 = vadd.f32 %v633_v49, %v545_v59 }
  0xbd   : > { %v683_v16 = vpop.f32.mrf.mxu3 }
  0xbe   : > { %v712_v63 = vmax.f32 %v634_v61, 0.0 }
  0xbf   : > { %v641_v0 = vpop.f32.mrf.mxu1  ;;  %v1612_v2 = vpop.f32.mrf.mxu2 }
  0xc0   : > { %v1165_v1 = vpack.c.bf16 %v712_v63, %v711_v62 }
  0xc1   : > { %v547_v3 = vpop.f32.mrf.mxu0 }
  0xc2   : > { %1166 = vst [vmem:[%s1614_s11] sm:$0xff] %v1165_v1   ;;  %v548_v5 = vadd.f32 %v1603_v53, %v547_v3 }
  0xc4   : > { %v637_v9 = vadd.f32 %v636_v50, %v548_v5 }
  0xc5   : > { %v686_v29 = vpop.f32.mrf.mxu3 }
  0xc6   : > { %v713_v13 = vmax.f32 %v637_v9, 0.0 }
  0xc7   : > { %v643_v6 = vpop.f32.mrf.mxu1  ;;  %v587_v7 = vpop.f32.mrf.mxu2 }
  0xc8   : > { %v588_v12 = vadd.f32 %v1603_v53, %v587_v7 }
  0xc9   : > { %v549_v8 = vpop.f32.mrf.mxu0 }
  0xca   : > { %v550_v10 = vadd.f32 %v1603_v53, %v549_v8  ;;  %v677_v19 = vadd.f32 %v676_v51, %v588_v12 }
  0xcc   : > { %v639_v11 = vadd.f32 %v638_v55, %v550_v10  ;;  %v729_v23 = vmax.f32 %v677_v19, 0.0 }
  0xcd   : > { %v688_v43 = vpop.f32.mrf.mxu3 }
  0xce   : > { %v714_v14 = vmax.f32 %v639_v11, 0.0 }
  0xcf   : > { %v646_v15 = vpop.f32.mrf.mxu1  ;;  %v589_v18 = vpop.f32.mrf.mxu2 }
  0xd0   : > { %v1170_v17 = vpack.c.bf16 %v714_v14, %v713_v13  ;;  %v590_v20 = vadd.f32 %v1603_v53, %v589_v18 }
  0xd1   : > { %v552_v21 = vpop.f32.mrf.mxu0 }
  0xd2   : > { %1242 = vst [vmem:[%s1614_s11 + $0x8] sm:$0xff] %v1170_v17   ;;  %v679_v22 = vadd.f32 %v678_v60, %v590_v20  ;;  %v553_v25 = vadd.f32 %v1603_v53, %v552_v21 }
  0xd4   : > { %v730_v24 = vmax.f32 %v679_v22, 0.0  ;;  %v642_v31 = vadd.f32 %v641_v0, %v553_v25 }
  0xd5   : > { %v691_v57 = vpop.f32.mrf.mxu3 }
  0xd6   : > { %v1210_v27 = vpack.c.bf16 %v730_v24, %v729_v23  ;;  %v715_v35 = vmax.f32 %v642_v31, 0.0 }
  0xd7   : > { %v648_v26 = vpop.f32.mrf.mxu1  ;;  %v592_v28 = vpop.f32.mrf.mxu2 }
  0xd8   : > { %1250 = vst [vmem:[%s1614_s11 + $0x48] sm:$0xff] %v1210_v27   ;;  %v593_v34 = vadd.f32 %v1603_v53, %v592_v28 }
  0xd9   : > { %v554_v30 = vpop.f32.mrf.mxu0 }
  0xda   : > { %v555_v32 = vadd.f32 %v1603_v53, %v554_v30  ;;  %v682_v40 = vadd.f32 %v681_v4, %v593_v34 }
  0xdc   : > { %v644_v33 = vadd.f32 %v643_v6, %v555_v32  ;;  %v731_v45 = vmax.f32 %v682_v40, 0.0 }
  0xdd   : > { %v693_v9 = vpop.f32.mrf.mxu3 }
  0xde   : > { %v716_v36 = vmax.f32 %v644_v33, 0.0 }
  0xdf   : > { %v651_v37 = vpop.f32.mrf.mxu1  ;;  %v594_v39 = vpop.f32.mrf.mxu2 }
  0xe0   : > { %v1175_v38 = vpack.c.bf16 %v716_v36, %v715_v35  ;;  %v595_v41 = vadd.f32 %v1603_v53, %v594_v39 }
  0xe1   : > { %v557_v42 = vpop.f32.mrf.mxu0 }
  0xe2   : > { %1243 = vst [vmem:[%s1614_s11 + $0x10] sm:$0xff] %v1175_v38   ;;  %v684_v44 = vadd.f32 %v683_v16, %v595_v41  ;;  %v558_v47 = vadd.f32 %v1603_v53, %v557_v42 }
  0xe4   : > { %v732_v46 = vmax.f32 %v684_v44, 0.0  ;;  %v647_v52 = vadd.f32 %v646_v15, %v558_v47 }
  0xe5   : > { %v696_v22 = vpop.f32.mrf.mxu3 }
  0xe6   : > { %v1215_v49 = vpack.c.bf16 %v732_v46, %v731_v45  ;;  %v717_v59 = vmax.f32 %v647_v52, 0.0 }
  0xe7   : > { %v653_v48 = vpop.f32.mrf.mxu1  ;;  %v597_v50 = vpop.f32.mrf.mxu2 }
  0xe8   : > { %1251 = vst [vmem:[%s1614_s11 + $0x50] sm:$0xff] %v1215_v49   ;;  %v598_v58 = vadd.f32 %v1603_v53, %v597_v50 }
  0xe9   : > { %v559_v51 = vpop.f32.mrf.mxu0 }
  0xea   : > { %v560_v54 = vadd.f32 %v1603_v53, %v559_v51  ;;  %v687_v0 = vadd.f32 %v686_v29, %v598_v58 }
  0xec   : > { %v649_v55 = vadd.f32 %v648_v26, %v560_v54  ;;  %v733_v5 = vmax.f32 %v687_v0, 0.0 }
  0xed   : > { %v698_v36 = vpop.f32.mrf.mxu3 }
  0xee   : > { %v718_v60 = vmax.f32 %v649_v55, 0.0 }
  0xef   : > { %v656_v61 = vpop.f32.mrf.mxu1  ;;  %v599_v63 = vpop.f32.mrf.mxu2 }
  0xf0   : > { %v1180_v62 = vpack.c.bf16 %v718_v60, %v717_v59  ;;  %v600_v1 = vadd.f32 %v1603_v53, %v599_v63 }
  0xf1   : > { %v562_v3 = vpop.f32.mrf.mxu0 }
  0xf2   : > { %1244 = vst [vmem:[%s1614_s11 + $0x18] sm:$0xff] %v1180_v62   ;;  %v689_v4 = vadd.f32 %v688_v43, %v600_v1  ;;  %v563_v7 = vadd.f32 %v1603_v53, %v562_v3 }
  0xf4   : > { %v734_v6 = vmax.f32 %v689_v4, 0.0  ;;  %v652_v13 = vadd.f32 %v651_v37, %v563_v7 }
  0xf6   : > { %v1220_v10 = vpack.c.bf16 %v734_v6, %v733_v5  ;;  %v719_v17 = vmax.f32 %v652_v13, 0.0 }
  0xf7   : > { %v658_v8 = vpop.f32.mrf.mxu1  ;;  %v602_v11 = vpop.f32.mrf.mxu2 }
  0xf8   : > { %1252 = vst [vmem:[%s1614_s11 + $0x58] sm:$0xff] %v1220_v10   ;;  %v603_v16 = vadd.f32 %v1603_v53, %v602_v11  ;;  %v585_v10 = vadd.f32 %v1603_v53, %v1612_v2 }
  0xf9   : > { %v564_v12 = vpop.f32.mrf.mxu0 }
  0xfa   : > { %v565_v14 = vadd.f32 %v1603_v53, %v564_v12  ;;  %v692_v23 = vadd.f32 %v691_v57, %v603_v16 }
  0xfc   : > { %v654_v15 = vadd.f32 %v653_v48, %v565_v14  ;;  %v735_v27 = vmax.f32 %v692_v23, 0.0  ;;  %v701_v48 = vpop.f32.mrf.mxu3 }
  0xfe   : > { %v720_v18 = vmax.f32 %v654_v15, 0.0 }
  0xff   : > { %v661_v19 = vpop.f32.mrf.mxu1  ;;  %v604_v21 = vpop.f32.mrf.mxu2 }
 0x100   : > { %v1185_v20 = vpack.c.bf16 %v720_v18, %v719_v17  ;;  %v605_v24 = vadd.f32 %v1603_v53, %v604_v21 }
 0x101   : > { %v567_v25 = vpop.f32.mrf.mxu0 }
 0x102   : > { %1245 = vst [vmem:[%s1614_s11 + $0x20] sm:$0xff] %v1185_v20   ;;  %v694_v26 = vadd.f32 %v693_v9, %v605_v24  ;;  %v568_v29 = vadd.f32 %v1603_v53, %v567_v25 }
 0x104   : > { %v736_v28 = vmax.f32 %v694_v26, 0.0  ;;  %v657_v34 = vadd.f32 %v656_v61, %v568_v29  ;;  %v703_v0 = vpop.f32.mrf.mxu3 }
 0x106   : > { %v1225_v31 = vpack.c.bf16 %v736_v28, %v735_v27  ;;  %v721_v39 = vmax.f32 %v657_v34, 0.0 }
 0x107   : > { %v663_v30 = vpop.f32.mrf.mxu1  ;;  %v607_v32 = vpop.f32.mrf.mxu2 }
 0x108   : > { %1253 = vst [vmem:[%s1614_s11 + $0x60] sm:$0xff] %v1225_v31   ;;  %v608_v38 = vadd.f32 %v1603_v53, %v607_v32 }
 0x109   : > { %v569_v33 = vpop.f32.mrf.mxu0 }
 0x10a   : > { %v570_v35 = vadd.f32 %v1603_v53, %v569_v33  ;;  %v697_v44 = vadd.f32 %v696_v22, %v608_v38 }
 0x10c   : > { %v659_v37 = vadd.f32 %v658_v8, %v570_v35  ;;  %v737_v49 = vmax.f32 %v697_v44, 0.0  ;;  %v583_v8 = vadd.f32 %v1603_v53, %v1606_v56  ;;  %v706_v18 = vpop.f32.mrf.mxu3 }
 0x10e   : > { %v722_v40 = vmax.f32 %v659_v37, 0.0 }
 0x10f   : > { %v666_v41 = vpop.f32.mrf.mxu1  ;;  %v609_v43 = vpop.f32.mrf.mxu2 }
 0x110   : > { %v1190_v42 = vpack.c.bf16 %v722_v40, %v721_v39  ;;  %v610_v45 = vadd.f32 %v1603_v53, %v609_v43 }
 0x111   : > { %v572_v46 = vpop.f32.mrf.mxu0 }
 0x112   : > { %1246 = vst [vmem:[%s1614_s11 + $0x28] sm:$0xff] %v1190_v42   ;;  %v699_v47 = vadd.f32 %v698_v36, %v610_v45  ;;  %v573_v51 = vadd.f32 %v1603_v53, %v572_v46 }
 0x114   : > { %v738_v50 = vmax.f32 %v699_v47, 0.0  ;;  %v662_v58 = vadd.f32 %v661_v19, %v573_v51  ;;  %v708_v32 = vpop.f32.mrf.mxu3 }
 0x116   : > { %v1230_v54 = vpack.c.bf16 %v738_v50, %v737_v49  ;;  %v723_v62 = vmax.f32 %v662_v58, 0.0 }
 0x117   : > { %v668_v52 = vpop.f32.mrf.mxu1  ;;  %v612_v55 = vpop.f32.mrf.mxu2 }
 0x118   : > { %1254 = vst [vmem:[%s1614_s11 + $0x68] sm:$0xff] %v1230_v54   ;;  %v613_v61 = vadd.f32 %v1603_v53, %v612_v55 }
 0x119   : > { %v574_v57 = vpop.f32.mrf.mxu0 }
 0x11a   : > { %v575_v59 = vadd.f32 %v1603_v53, %v574_v57  ;;  %v702_v5 = vadd.f32 %v701_v48, %v613_v61 }
 0x11c   : > { %v664_v60 = vadd.f32 %v663_v30, %v575_v59  ;;  %v739_v11 = vmax.f32 %v702_v5, 0.0 }
 0x11e   : > { %v724_v63 = vmax.f32 %v664_v60, 0.0 }
 0x11f   : > { %v671_v1 = vpop.f32.mrf.mxu1  ;;  %v614_v4 = vpop.f32.mrf.mxu2 }
 0x120   : > { %v1195_v3 = vpack.c.bf16 %v724_v63, %v723_v62  ;;  %v615_v6 = vadd.f32 %v1603_v53, %v614_v4  ;;  %v672_v12 = vadd.f32 %v671_v1, %v583_v8 }
 0x121   : > { %v577_v7 = vpop.f32.mrf.mxu0 }
 0x122   : > { %1247 = vst [vmem:[%s1614_s11 + $0x30] sm:$0xff] %v1195_v3   ;;  %v704_v9 = vadd.f32 %v703_v0, %v615_v6  ;;  %v578_v14 = vadd.f32 %v1603_v53, %v577_v7  ;;  %v727_v20 = vmax.f32 %v672_v12, 0.0 }
 0x124   : > { %v740_v13 = vmax.f32 %v704_v9, 0.0  ;;  %v667_v22 = vadd.f32 %v666_v41, %v578_v14 }
 0x126   : > { %v1235_v16 = vpack.c.bf16 %v740_v13, %v739_v11  ;;  %v725_v26 = vmax.f32 %v667_v22, 0.0 }
 0x127   : > { %v673_v15 = vpop.f32.mrf.mxu1  ;;  %v617_v19 = vpop.f32.mrf.mxu2 }
 0x128   : > { %v674_v17 = vadd.f32 %v673_v15, %v585_v10  ;;  %1255 = vst [vmem:[%s1614_s11 + $0x70] sm:$0xff] %v1235_v16   ;;  %v618_v25 = vadd.f32 %v1603_v53, %v617_v19 }
 0x129   : > { %v579_v56 = vpop.f32.mrf.mxu0 }
 0x12a   : > { %v728_v21 = vmax.f32 %v674_v17, 0.0  ;;  %v580_v2 = vadd.f32 %v1603_v53, %v579_v56  ;;  %v707_v30 = vadd.f32 %v706_v18, %v618_v25 }
 0x12c   : > { %v1205_v23 = vpack.c.bf16 %v728_v21, %v727_v20  ;;  %v669_v24 = vadd.f32 %v668_v52, %v580_v2  ;;  %v741_v34 = vmax.f32 %v707_v30, 0.0 }
 0x12e   : > { %1249 = vst [vmem:[%s1614_s11 + $0x40] sm:$0xff] %v1205_v23   ;;  %v726_v27 = vmax.f32 %v669_v24, 0.0 }
 0x12f   : > { %v619_v29 = vpop.f32.mrf.mxu2 }
 0x130   : > { %v1200_v28 = vpack.c.bf16 %v726_v27, %v725_v26  ;;  %v620_v31 = vadd.f32 %v1603_v53, %v619_v29 }
 0x132   : > { %1248 = vst [vmem:[%s1614_s11 + $0x38] sm:$0xff] %v1200_v28   ;;  %v709_v33 = vadd.f32 %v708_v32, %v620_v31 }
 0x134   : > { %v742_v35 = vmax.f32 %v709_v33, 0.0 }
 0x136   : > { %v1240_v36 = vpack.c.bf16 %v742_v35, %v741_v34 }
 0x138   : > { %1256 = vst [vmem:[%s1614_s11 + $0x78] sm:$0xff] %v1240_v36  }
 0x139   : > { %1353 = shalt.err (!%p1350_p5)
}
 0x13a   : > { %s1407_s8 = smov 64   ;;  %s1408_s9 = smov 4  }
 0x13b   : > { %1267 = dma.vmem_to_hbm [thread:$0]  (%p1469_p4), %s822_s26, 2048, %s824_s27, %s808_s15, %s1407_s8, %s1407_s8, %s1408_s9  }
 0x13c PF: > { %p1273_p6 = scmp.ge.s32.totalorder %s1404_s17, 2  ;;  %s838_s10 = sand.u32 1, %s1384_s12  }
 0x13d   : > { %s839_s11 = scalar_lea.sflag [#allocation3], %s838_s10 }
 0x13e   : > { %p1270_p7 = pnand %p1273_p6, %p1476_p8 }
 0x140   : > { %p1271_p9 = pneg %p1270_p7 }
 0x142   : > { %1379 = dma.done.wait (%p1271_p9), %s839_s11, 2048  }
 0x143   : > { %1381 = vsyncadd (%p1271_p9), %s839_s11, 4294965248  ;;  %s16_s17 = sadd.s32 1, %s1404_s17   ;;  %s1709_s12 = smov %s1388_s13 }
 0x144   : > { %p13_p10 = scmp.ge.s32.totalorder %s16_s17, 10   ;;  %s1710_s13 = smov %s1392_s14 }
 0x145   : > { %s1711_s14 = smov %s1482_s25  ;;  %s1712_s15 = smov %s1400_s16 }
 0x146   : > { %s1713_s16 = smov %s1715_s20  ;;  %15 = sbr.rel (!%p13_p10) target bundleno = 4 (0x4), region = 73 }
 0x14b   :  { %845 = vsyncpa [#allocation3], 1 }
 0x14c   :  { %847 = vsyncpa [#allocation3 + $0x1], 1 }

</bundles_post_ra>
